<compile_context>
chip_gen: v7x
topology: tpu7x:2x2x1
jax: 0.10.0
libtpu: 0.0.40
codegen_flags: <defaults>
</compile_context>

<pallas_src>
import functools

import jax
import jax.numpy as jnp
from jax.experimental import pallas as pl
from jax.experimental.pallas import tpu as pltpu

_LANES = 1024         # lane-dense last dim (multiple of 128) -> unmasked vst
_MAX_TILE_ROWS = 512  # 512x1024 f32 = 2 MiB/tile; 2x(in)+2x(out) buffers =
                      # 8 MiB, under v5e's 16 MiB scoped-VMEM default.


def _scale_kernel(x_ref, o_ref, *, scale):
    """Fused (uint8 ->) f32 cast + elementwise scale on one VMEM tile."""
    x = x_ref[...].astype(jnp.float32)          # direct narrow->f32 unpack
    o_ref[...] = (x * scale).astype(o_ref.dtype)


def _pick_tile_rows(rows):
    """Adaptive row tile: >= ~4 grid steps for pipelining / dual-TC sharding,
    sublane-aligned, capped for v5e's scoped-VMEM budget."""
    if rows <= 8:
        return rows                       # single (full-array) block
    target = -(-rows // 4)                # cdiv(rows, 4)
    target = -(-target // 8) * 8          # round up to a sublane multiple
    return max(8, min(_MAX_TILE_ROWS, target))


def _scale_2d(x2d, scale, out_dtype, *, allow_alias):
    """Tiled elementwise scale over a (rows, _LANES) slab."""
    rows, cols = x2d.shape
    tile_rows = _pick_tile_rows(rows)
    # Last block may be row-partial: lanes stay a dense 1024, so the masked
    # sublane store on the tail block is cheap (no zero-padding traffic).
    grid = (pl.cdiv(rows, tile_rows),)

    total = rows * cols
    bytes_accessed = total * (
        jnp.dtype(x2d.dtype).itemsize + jnp.dtype(out_dtype).itemsize
    )
    cost = pl.CostEstimate(
        flops=total, transcendentals=0, bytes_accessed=bytes_accessed
    )

    # In-place aliasing only when this is the genuine (unpadded) input with
    # the same dtype: avoids a separate output allocation in HBM.
    alias = (
        {0: 0}
        if allow_alias and jnp.dtype(x2d.dtype) == jnp.dtype(out_dtype)
        else {}
    )

    return pl.pallas_call(
        functools.partial(_scale_kernel, scale=scale),
        out_shape=jax.ShapeDtypeStruct((rows, cols), out_dtype),
        grid=grid,
        in_specs=[pl.BlockSpec((tile_rows, cols), lambda i: (i, 0))],
        out_specs=pl.BlockSpec((tile_rows, cols), lambda i: (i, 0)),
        compiler_params=pltpu.CompilerParams(
            dimension_semantics=("parallel",),
        ),
        cost_estimate=cost,
        input_output_aliases=alias,
    )(x2d)


def image_data_processor(x, normalize=1):
    """JAX/Pallas equivalent of ImageDataProcessor.forward.

    Args:
      x: NCHW array (any shape; op is elementwise). Float dtypes are
         preserved; integer dtypes (raw image data, e.g. uint8) are cast to
         float32 inside the kernel, matching PyTorch's promotion when scaling
         by 255.0.
      normalize: static Python int/bool flag (PyTorch semantics).
    Returns:
      x / 255.0 if normalize else x * 255.0.
    """
    x = jnp.asarray(x)
    out_dtype = x.dtype if jnp.issubdtype(x.dtype, jnp.floating) else jnp.float32
    scale = (1.0 / 255.0) if normalize else 255.0

    orig_shape = x.shape
    total = x.size
    if total == 0:
        return x.astype(out_dtype)

    cols = _LANES
    rows = pl.cdiv(total, cols)
    padded_total = rows * cols

    flat = x.reshape(-1)
    if padded_total != total:
        # Rare fallback: element count is not a multiple of 1024. Pad only up
        # to the next lane multiple (<= 1023 elements); typical image shapes
        # (H*W multiples of 256/1024) take the zero-copy path instead.
        flat = jnp.pad(flat, (0, padded_total - total))
    x2d = flat.reshape(rows, cols)

    y2d = _scale_2d(x2d, scale, out_dtype, allow_alias=(padded_total == total))

    y = y2d.reshape(-1)
    if padded_total != total:
        y = y[:total]
    return y.reshape(orig_shape)


if __name__ == "__main__":
    key = jax.random.PRNGKey(0)

    # Small NCHW float image batch, values in [0, 255] like raw image data.
    x = jax.random.uniform(key, (2, 4, 16, 16), dtype=jnp.float32) * 255.0

    # normalize=1 path (unpadded, aliased, single-block grid).
    y_norm = jax.block_until_ready(image_data_processor(x, normalize=1))
    assert y_norm.shape == x.shape and y_norm.dtype == x.dtype
    assert jnp.allclose(y_norm, x / 255.0, rtol=1e-6, atol=1e-6)

    # normalize=0 path.
    y_denorm = jax.block_until_ready(image_data_processor(x, normalize=0))
    assert jnp.allclose(y_denorm, x * 255.0, rtol=1e-6, atol=1e-6)

    # Raw uint8 image batch: exercises the fused in-kernel uint8->f32 cast and
    # the multi-step pipelined grid with a row-partial final block
    # (rows=294, tile_rows=80, grid=4; no zero-padding traffic).
    x_u8 = jax.random.randint(
        jax.random.PRNGKey(0), (2, 3, 224, 224), 0, 256, dtype=jnp.int32
    ).astype(jnp.uint8)
    y_u8 = jax.block_until_ready(image_data_processor(x_u8, normalize=1))
    assert y_u8.dtype == jnp.float32 and y_u8.shape == x_u8.shape
    assert jnp.allclose(
        y_u8, x_u8.astype(jnp.float32) / 255.0, rtol=1e-6, atol=1e-6
    )

    # Odd size (not a multiple of 1024): exercises the small-pad fallback.
    x_odd = jax.random.uniform(key, (2, 3, 15, 15), dtype=jnp.float32) * 255.0
    y_odd = jax.block_until_ready(image_data_processor(x_odd, normalize=1))
    assert y_odd.shape == x_odd.shape
    assert jnp.allclose(y_odd, x_odd / 255.0, rtol=1e-6, atol=1e-6)

    print("KERNEL_OK")
</pallas_src>

<mosaic_0001>
module attributes {stable_mosaic.version = 11 : i64} {
  func.func @_scale_kernel(%arg0: i32, %arg1: memref<2x1024xf32, #tpu.memory_space<vmem>>, %arg2: memref<2x1024xf32, #tpu.memory_space<vmem>>) attributes {dimension_semantics = [#tpu.dimension_semantics<parallel>], iteration_bounds = array<i64: 1>, scalar_prefetch = 0 : i64, scratch_operands = 0 : i64, tpu.core_type = #tpu.core_type<tc>, window_params = [{transform_indices = @transform_0, window_bounds = array<i64: 2, 1024>}, {transform_indices = @transform_1, window_bounds = array<i64: 2, 1024>}]} {
    %c0 = arith.constant 0 : index
    %c0_0 = arith.constant 0 : index
    %0 = vector.load %arg1[%c0, %c0_0] : memref<2x1024xf32, #tpu.memory_space<vmem>>, vector<2x1024xf32>
    %cst = arith.constant 0.00392156886 : f32
    %1 = vector.broadcast %cst : f32 to vector<2x1024xf32>
    %2 = arith.mulf %0, %1 : vector<2x1024xf32>
    %c0_1 = arith.constant 0 : index
    %c0_2 = arith.constant 0 : index
    %3 = vector.load %arg2[%c0_1, %c0_2] : memref<2x1024xf32, #tpu.memory_space<vmem>>, vector<2x1024xf32>
    tpu.vector_store %arg2[%c0_1, %c0_2], %2 {strides = array<i32>} : memref<2x1024xf32, #tpu.memory_space<vmem>>, vector<2x1024xf32>,
    return
  }
  func.func @transform_0(%arg0: i32) -> (i32, i32) {
    %c0_i32 = arith.constant 0 : i32
    %c0_i32_0 = arith.constant 0 : i32
    return %arg0, %c0_i32 : i32, i32
  }
  func.func @transform_1(%arg0: i32) -> (i32, i32) {
    %c0_i32 = arith.constant 0 : i32
    %c0_i32_0 = arith.constant 0 : i32
    return %arg0, %c0_i32 : i32, i32
  }
}

</mosaic_0001>

<bundles_post_ra>
// kernel: tpu_custom_call.1
= control target key start
LH: loop header
LB: loop body
LE: loop exit
PB: predicated region body
PF: predicated region fallthrough
CT: control target
= control target key end

     0   :  { %6 = vsyncpa [#allocation3], 0  ;;  %s128_s0 = inlined_call_operand.hbm [shape: f32[2,1024], index: 0, kind: input, shape index: {}, may-alias: {0,1}]   ;;  %s129_s1 = inlined_call_operand.hbm [shape: f32[2,1024], index: 1, kind: output, shape index: {}, may-alias: {0,1}]  }
   0x1   :  { %7 = vsyncpa [#allocation4], 0  ;;  %s92_s6 = smov [#allocation2]   ;;  %s44_s10 = scalar_lea.hbm %s128_s0, 256 }
   0x2   :  { %s14_s7 = sshll.u32 %s92_s6, 4  ;;  %p45_p0 = scmp.ne.s32.totalorder %s128_s0, %s44_s10  ;;  %s15_s7 = int_to_ptr.vmem [resolvable:$true] %s14_s7 }
   0x3   :  { %p48_p1 = scmp.lt.u32.totalorder %s44_s10, %s128_s0 }
   0x5   :  { %p50_p2 = pnand %p48_p1, %p45_p0 }
   0x7   :  { %53 = shalt.err (!%p50_p2)
}
   0x8   :  { %s54_s15 = scalar_lea.vmem %s15_s7, 256  ;;  %p59_p4 = scmp.lt.s32.totalorder %s15_s7, %s15_s7 }
   0x9   :  { %p55_p3 = scmp.ne.s32.totalorder %s15_s7, %s54_s15  ;;  %p60_p5 = scmp.lt.s32.totalorder %s54_s15, %s54_s15 }
   0xb   :  { %p61_p6 = por %p60_p5, %p59_p4 }
   0xd   :  { %p62_p7 = pnand %p61_p6, %p55_p3 }
   0xf   :  { %65 = shalt.err (!%p62_p7)
}
  0x10   :  { %17 = dma.hbm_to_vmem [thread:$0]  %s128_s0, 256, %s15_s7, [#allocation3]  }
  0x11   :  { %88 = dma.done.wait [#allocation3], 256  }
  0x12   :  { %89 = vsyncadd [#allocation3], 4294967040  ;;  %s93_s18 = smov [#allocation5]   ;;  %v21_v0 = vld [vmem:[#allocation2] sm:$0xff]  ;;  %v22_v1 = vld [vmem:[#allocation2 + $0x8] sm:$0xff] }
  0x13   :  { %s33_s19 = sshll.u32 %s93_s18, 4  ;;  %v23_v2 = vmul.f32 0.003921569, %v21_v0  ;;  %v24_v3 = vmul.f32 0.003921569, %v22_v1  ;;  %s34_s19 = int_to_ptr.vmem [resolvable:$true] %s33_s19 }
  0x14   :  { %s66_s20 = scalar_lea.vmem %s34_s19, 256  ;;  %p71_p9 = scmp.lt.s32.totalorder %s34_s19, %s34_s19 }
  0x15   :  { %25 = vst [vmem:[#allocation5] sm:$0xff] %v23_v2  ;;  %26 = vst [vmem:[#allocation5 + $0x8] sm:$0xff] %v24_v3  ;;  %p67_p8 = scmp.ne.s32.totalorder %s34_s19, %s66_s20  ;;  %p72_p10 = scmp.lt.s32.totalorder %s66_s20, %s66_s20 }
  0x17   :  { %p73_p11 = por %p72_p10, %p71_p9 }
  0x19   :  { %p74_p12 = pnand %p73_p11, %p67_p8 }
  0x1b   :  { %77 = shalt.err (!%p74_p12)
}
  0x1c   :  { %s78_s22 = scalar_lea.hbm %s129_s1, 256 }
  0x1d   :  { %p79_p13 = scmp.ne.s32.totalorder %s129_s1, %s78_s22  ;;  %p82_p0 = scmp.lt.u32.totalorder %s78_s22, %s129_s1 }
  0x1f   :  { %p84_p1 = pnand %p82_p0, %p79_p13 }
  0x21   :  { %87 = shalt.err (!%p84_p1)
}
  0x22   :  { %36 = dma.vmem_to_hbm [thread:$0]  %s34_s19, 256, %s129_s1, [#allocation4]  }
  0x23   :  { %90 = dma.done.wait [#allocation4], 256  }
  0x24   :  { %91 = vsyncadd [#allocation4], 4294967040 }
  0x25   :  { %40 = vsyncpa [#allocation3], 1 }
  0x26   :  { %41 = vsyncpa [#allocation4], 1 }

</bundles_post_ra>
